<compile_context>
chip_gen: v7x
topology: tpu7x:2x2x1
jax: 0.10.0
libtpu: 0.0.40
codegen_flags: <defaults>
</compile_context>

<pallas_src>
import jax
import jax.numpy as jnp
from jax.experimental import pallas as pl
from jax.experimental.pallas import tpu as pltpu


def mlp1_kernel(h_ref, w3_ref, b3_ref, w4_ref, b4_ref, out_ref):
    # linear3 on the MXU: bf16 operands, f32 accumulate.  The f32->bf16 cast
    # of the hidden tile happens in-kernel (cheap VPU work, hidden under DMA).
    h = h_ref[...].astype(jnp.bfloat16)                               # (BT, 3E)
    z = jnp.dot(h, w3_ref[...], preferred_element_type=jnp.float32)   # (BT, E) f32
    a = jax.nn.sigmoid(z + b3_ref[...])                               # f32 VPU/EUP
    # linear4 as an NT matmul (contract over E on both operands, like q @ k^T):
    # result is (1, BT) with batch on lanes -> lane-dense output stores.
    r = jax.lax.dot_general(
        w4_ref[...], a.astype(jnp.bfloat16),
        (((1,), (1,)), ((), ())),
        preferred_element_type=jnp.float32)                           # (1, BT)
    out_ref[...] = (r + b4_ref[0]).astype(out_ref.dtype).reshape(out_ref.shape)


def _round_up(x, m):
    return ((x + m - 1) // m) * m


# Double-buffered f32 hidden tiles must fit this budget (v5e scoped-VMEM
# default is 16 MiB; v6e/v7x are 32 MiB, so no vmem_limit_bytes override
# is needed at these shapes).
_VMEM_INPUT_BUDGET = 12 * 1024 * 1024


def _pick_batch_tile(batch, three_e):
    bt = _round_up(batch, 8)              # sublane granularity
    if bt <= 512:
        return bt                         # small batch: one tile, one step
    # Byte-derived cap: 2 (double-buffer) x BT x 3E x 4B <= budget.
    cap = _VMEM_INPUT_BUDGET // (2 * three_e * 4)
    cap = max(256, min(8192, (cap // 256) * 256))
    # Keep nb >= 2 for large batches so both v7x TensorCores get work
    # (batch axis is "parallel"); harmless on single-TC v5e/v6e.
    half = _round_up(-(-batch // 2), 256)
    return min(cap, half, _round_up(bt, 256))


def mlp1_forward(hidden, w3, b3, w4, b4):
    """hidden: (B, 3*emsize) f32.
    w3: (3*emsize, emsize)  [pre-transposed vs torch], b3: (1, emsize),
    w4: (1, emsize)         [same layout as torch linear4.weight], b4: (1,).
    Returns torch.squeeze(linear4(sigmoid(linear3(hidden)))): shape (B,)
    (a 0-d scalar when B == 1, matching torch.squeeze)."""
    B, three_e = hidden.shape
    E = w3.shape[1]
    assert three_e == 3 * E and w3.shape[0] == three_e
    assert b3.shape == (1, E) and w4.shape == (1, E) and b4.shape == (1,)

    BT = _pick_batch_tile(B, three_e)
    nb = pl.cdiv(B, BT)

    # Only the small, read-once, VMEM-resident weights are cast outside the
    # kernel; hidden stays f32 in HBM and is cast in-kernel (no extra HBM pass).
    w3_bf = w3.astype(jnp.bfloat16)
    w4_bf = w4.astype(jnp.bfloat16)

    out = pl.pallas_call(
        mlp1_kernel,
        out_shape=jax.ShapeDtypeStruct((nb, 1, BT), jnp.float32),
        grid_spec=pltpu.PrefetchScalarGridSpec(
            num_scalar_prefetch=0,
            grid=(nb,),
            in_specs=[
                pl.BlockSpec((BT, three_e), lambda i: (i, 0)),      # hidden tile (f32)
                pl.BlockSpec((three_e, E), lambda i: (0, 0)),       # w3 resident (bf16)
                pl.BlockSpec((1, E), lambda i: (0, 0)),             # b3 resident (f32)
                pl.BlockSpec((1, E), lambda i: (0, 0)),             # w4 resident (bf16)
                pl.BlockSpec(memory_space=pltpu.MemorySpace.SMEM),  # b4 scalar
            ],
            out_specs=pl.BlockSpec((1, 1, BT), lambda i: (i, 0, 0)),  # lane-dense
        ),
        compiler_params=pltpu.CompilerParams(
            dimension_semantics=("parallel",),
        ),
    )(hidden, w3_bf, b3, w4_bf, b4)

    # Flatten (nb, 1, BT) -> (nb*BT,) and drop don't-care tail rows from the
    # final partial block.
    rating = out.reshape(-1)[:B]
    return jnp.squeeze(rating)   # matches torch.squeeze semantics


def init_params(key, emsize):
    """Mirrors MLP1.init_weights(): uniform(-0.1, 0.1) weights, zero biases.
    w3 stored (in, out); w4 stored (1, emsize) (same as torch linear4.weight)."""
    initrange = 0.1
    k3, k4 = jax.random.split(key)
    w3 = jax.random.uniform(k3, (emsize * 3, emsize), jnp.float32,
                            minval=-initrange, maxval=initrange)
    b3 = jnp.zeros((1, emsize), jnp.float32)
    w4 = jax.random.uniform(k4, (1, emsize), jnp.float32,
                            minval=-initrange, maxval=initrange)
    b4 = jnp.zeros((1,), jnp.float32)
    return w3, b3, w4, b4


def _reference(hidden, w3, b3, w4, b4):
    a = jax.nn.sigmoid(
        jnp.dot(hidden, w3, precision=jax.lax.Precision.HIGHEST) + b3)
    return jnp.squeeze(jnp.sum(a * w4, axis=-1, keepdims=True) + b4[0])


if __name__ == "__main__":
    key = jax.random.PRNGKey(0)
    k_param, k_x1, k_x2, k_x3 = jax.random.split(key, 4)

    emsize = 32
    w3, b3, w4, b4 = init_params(k_param, emsize)

    # Case 1: small batch, single tile.
    h1 = jax.random.normal(k_x1, (8, emsize * 3), jnp.float32)
    r1 = jax.block_until_ready(mlp1_forward(h1, w3, b3, w4, b4))
    assert r1.shape == (8,)
    assert jnp.allclose(r1, _reference(h1, w3, b3, w4, b4), atol=2e-2, rtol=2e-2)

    # Case 2: batch not a multiple of 8 (exercises the padless partial block).
    h2 = jax.random.normal(k_x2, (5, emsize * 3), jnp.float32)
    r2 = jax.block_until_ready(mlp1_forward(h2, w3, b3, w4, b4))
    assert r2.shape == (5,)
    assert jnp.allclose(r2, _reference(h2, w3, b3, w4, b4), atol=2e-2, rtol=2e-2)

    # Case 3: batch larger than one tile (pipelined grid, nb >= 2, ragged tail).
    h3 = jax.random.normal(k_x3, (1030, emsize * 3), jnp.float32)
    r3 = jax.block_until_ready(mlp1_forward(h3, w3, b3, w4, b4))
    assert r3.shape == (1030,)
    assert jnp.allclose(r3, _reference(h3, w3, b3, w4, b4), atol=2e-2, rtol=2e-2)

    print("KERNEL_OK")
</pallas_src>

<mosaic_0001>
module attributes {stable_mosaic.version = 11 : i64} {
  func.func @mlp1_kernel(%arg0: i32, %arg1: memref<8x96xf32, #tpu.memory_space<vmem>>, %arg2: memref<96x32xbf16, #tpu.memory_space<vmem>>, %arg3: memref<1x32xf32, #tpu.memory_space<vmem>>, %arg4: memref<1x32xbf16, #tpu.memory_space<vmem>>, %arg5: memref<1xf32, #tpu.memory_space<smem>>, %arg6: memref<1x1x8xf32, #tpu.memory_space<vmem>>) attributes {dimension_semantics = [#tpu.dimension_semantics<parallel>], iteration_bounds = array<i64: 1>, scalar_prefetch = 0 : i64, scratch_operands = 0 : i64, tpu.core_type = #tpu.core_type<tc>, window_params = [{transform_indices = @transform_0, window_bounds = array<i64: 8, 96>}, {pipeline_mode = #tpu.pipeline_mode<synchronous>, transform_indices = @transform_1, window_bounds = array<i64: 96, 32>}, {pipeline_mode = #tpu.pipeline_mode<synchronous>, transform_indices = @transform_2, window_bounds = array<i64: 1, 32>}, {pipeline_mode = #tpu.pipeline_mode<synchronous>, transform_indices = @transform_3, window_bounds = array<i64: 1, 32>}, {transform_indices = @transform_4, window_bounds = array<i64: 1>}, {transform_indices = @transform_5, window_bounds = array<i64: 1, 1, 8>}]} {
    %c0 = arith.constant 0 : index
    %c0_0 = arith.constant 0 : index
    %0 = vector.load %arg1[%c0, %c0_0] : memref<8x96xf32, #tpu.memory_space<vmem>>, vector<8x96xf32>
    %1 = arith.truncf %0 : vector<8x96xf32> to vector<8x96xbf16>
    %c0_1 = arith.constant 0 : index
    %c0_2 = arith.constant 0 : index
    %2 = vector.load %arg2[%c0_1, %c0_2] : memref<96x32xbf16, #tpu.memory_space<vmem>>, vector<96x32xbf16>
    %cst = arith.constant dense<0.000000e+00> : vector<8x32xf32>
    %3 = tpu.matmul %1, %2, %cst {dimension_numbers = #tpu.dot_dimension_numbers<[1], [0], [0], [1], [0, 0, 1, 1], [], []>} : vector<8x96xbf16>, vector<96x32xbf16>, vector<8x32xf32> -> vector<8x32xf32>
    %c0_3 = arith.constant 0 : index
    %c0_4 = arith.constant 0 : index
    %4 = vector.load %arg3[%c0_3, %c0_4] : memref<1x32xf32, #tpu.memory_space<vmem>>, vector<1x32xf32>
    %5 = vector.broadcast %4 : vector<1x32xf32> to vector<8x32xf32>
    %6 = arith.addf %3, %5 : vector<8x32xf32>
    %7 = arith.negf %6 : vector<8x32xf32>
    %8 = math.exp %7 : vector<8x32xf32>
    %cst_5 = arith.constant 1.000000e+00 : f32
    %9 = vector.broadcast %cst_5 : f32 to vector<8x32xf32>
    %10 = arith.addf %9, %8 : vector<8x32xf32>
    %11 = arith.divf %9, %10 : vector<8x32xf32>
    %c0_6 = arith.constant 0 : index
    %c0_7 = arith.constant 0 : index
    %12 = vector.load %arg4[%c0_6, %c0_7] : memref<1x32xbf16, #tpu.memory_space<vmem>>, vector<1x32xbf16>
    %13 = arith.truncf %11 : vector<8x32xf32> to vector<8x32xbf16>
    %cst_8 = arith.constant dense<0.000000e+00> : vector<1x8xf32>
    %14 = tpu.matmul %12, %13, %cst_8 {dimension_numbers = #tpu.dot_dimension_numbers<[1], [1], [0], [0], [0, 0, 1, 0], [], []>} : vector<1x32xbf16>, vector<8x32xbf16>, vector<1x8xf32> -> vector<1x8xf32>
    %c0_9 = arith.constant 0 : index
    %15 = memref.load %arg5[%c0_9] : memref<1xf32, #tpu.memory_space<smem>>
    %16 = vector.broadcast %15 : f32 to vector<1x8xf32>
    %17 = arith.addf %14, %16 : vector<1x8xf32>
    %18 = vector.shape_cast %17 : vector<1x8xf32> to vector<1x1x8xf32>
    %c0_10 = arith.constant 0 : index
    %c0_11 = arith.constant 0 : index
    %c0_12 = arith.constant 0 : index
    %19 = vector.load %arg6[%c0_10, %c0_11, %c0_12] : memref<1x1x8xf32, #tpu.memory_space<vmem>>, vector<1x1x8xf32>
    tpu.vector_store %arg6[%c0_10, %c0_11, %c0_12], %18 {strides = array<i32>} : memref<1x1x8xf32, #tpu.memory_space<vmem>>, vector<1x1x8xf32>,
    return
  }
  func.func @transform_0(%arg0: i32) -> (i32, i32) {
    %c0_i32 = arith.constant 0 : i32
    %c0_i32_0 = arith.constant 0 : i32
    return %arg0, %c0_i32 : i32, i32
  }
  func.func @transform_1(%arg0: i32) -> (i32, i32) {
    %c0_i32 = arith.constant 0 : i32
    %c0_i32_0 = arith.constant 0 : i32
    %c0_i32_1 = arith.constant 0 : i32
    return %c0_i32, %c0_i32_0 : i32, i32
  }
  func.func @transform_2(%arg0: i32) -> (i32, i32) {
    %c0_i32 = arith.constant 0 : i32
    %c0_i32_0 = arith.constant 0 : i32
    %c0_i32_1 = arith.constant 0 : i32
    return %c0_i32, %c0_i32_0 : i32, i32
  }
  func.func @transform_3(%arg0: i32) -> (i32, i32) {
    %c0_i32 = arith.constant 0 : i32
    %c0_i32_0 = arith.constant 0 : i32
    %c0_i32_1 = arith.constant 0 : i32
    return %c0_i32, %c0_i32_0 : i32, i32
  }
  func.func @transform_4(%arg0: i32) -> i32 {
    %c0_i32 = arith.constant 0 : i32
    %c0_i32_0 = arith.constant 0 : i32
    return %c0_i32 : i32
  }
  func.func @transform_5(%arg0: i32) -> (i32, i32, i32) {
    %c0_i32 = arith.constant 0 : i32
    %c0_i32_0 = arith.constant 0 : i32
    %c0_i32_1 = arith.constant 0 : i32
    return %arg0, %c0_i32, %c0_i32_0 : i32, i32, i32
  }
}

</mosaic_0001>

<bundles_post_ra>
// kernel: tpu_custom_call.1
= control target key start
LH: loop header
LB: loop body
LE: loop exit
PB: predicated region body
PF: predicated region fallthrough
CT: control target
= control target key end

     0   :  { %v275_v1 = vmov 0.0   ;;  %vm276_vm0 = vmmov 0   ;;  %s350_s0 = inlined_call_operand.vmem [shape: f32[8,96], index: 0, kind: input, shape index: {}]   ;;  %s351_s1 = inlined_call_operand.vmem [shape: bf16[96,32], index: 1, kind: input, shape index: {}]   ;;  %s352_s2 = inlined_call_operand.vmem [shape: f32[1,32], index: 2, kind: input, shape index: {}]   ;;  %s353_s3 = inlined_call_operand.vmem [shape: bf16[1,32], index: 3, kind: input, shape index: {}]   ;;  %s354_s4 = inlined_call_operand.<no memory space> [shape: f32[1], index: 4, kind: input, shape index: {}]   ;;  %s355_s5 = inlined_call_operand.hbm [shape: f32[1,1,8], index: 5, kind: output, shape index: {}]  }
   0x1   :  { %v241_v0 = vld [vmem:[%s351_s1] sm:$0xff]   ;;  %216 = vmatprep.subr.bf16.mxu0 %v275_v1  ;;  %232 = vmatprep.subr.bf16.mxu1 %v275_v1  ;;  %v242_v2 = vld [vmem:[%s351_s1 + $0x8] sm:$0xff]   ;;  %v243_v3 = vld [vmem:[%s351_s1 + $0x10] sm:$0xff]  }
   0x2   :  { %217 = vmatpush3.bf16.msra.mxu0 %v241_v0  ;;  %228 = vmatprep.mubr.msk.bf16.mxu0 %vm276_vm0, %v275_v1 }
   0x3   :  { %218 = vmatprep.subr.bf16.mxu0 %v275_v1  ;;  %234 = vmatprep.mubr.msk.bf16.mxu1 %vm276_vm0, %v275_v1 }
   0x6   :  { %219 = vmatpush3.bf16.msra.mxu0 %v242_v2 }
   0x7   :  { %11 = vsyncpa [#allocation4], 0  ;;  %220 = vmatprep.subr.bf16.mxu0 %v275_v1  ;;  %v244_v4 = vld [vmem:[%s351_s1 + $0x18] sm:$0xff]   ;;  %v245_v5 = vld [vmem:[%s351_s1 + $0x20] sm:$0xff]   ;;  %vm80_vm1 = vcmask 785408   ;;  %vm134_vm2 = vcmask 261120   ;;  %v133_v22 = vstv %s354_s4 }
   0x8   :  { %v246_v6 = vld [vmem:[%s351_s1 + $0x28] sm:$0xff]   ;;  %v23_v7 = vld [vmem:[%s350_s0] sm:$0xff]  ;;  %s277_s10 = smov [#allocation3]   ;;  %vm181_vm3 = vcmask 57344  }
   0x9   :  { %v24_v8 = vpack.c.bf16 %v23_v7, %v23_v7  ;;  %v197_v9 = vld [vmem:[%s352_s2] ss:$0 sm:$0xff]  ;;  %s189_s11 = sshll.u32 %s277_s10, 4  ;;  %s190_s11 = int_to_ptr.vmem [resolvable:$true] %s189_s11 }
   0xa   :  { %221 = vmatpush3.bf16.msra.mxu0 %v243_v3  ;;  %v130_v21 = vld [vmem:[%s353_s3] sm:$0x1]  ;;  %s251_s12 = scalar_lea.vmem %s190_s11, 16  ;;  %s255_s13 = scalar_lea.vmem %s190_s11, 32 }
   0xb   :  { %222 = vmatprep.subr.bf16.mxu0 %v275_v1  ;;  %p252_p0 = scmp.ne.s32.totalorder %s190_s11, %s251_s12  ;;  %p256_p1 = scmp.lt.s32.totalorder %s190_s11, %s190_s11 }
   0xc   :  { %p257_p2 = scmp.lt.s32.totalorder %s255_s13, %s251_s12 }
   0xe   :  { %223 = vmatpush3.bf16.msra.mxu0 %v244_v4  ;;  %p258_p3 = por %p257_p2, %p256_p1 }
   0xf   :  { %224 = vmatprep.subr.bf16.mxu0 %v275_v1 }
  0x10   :  { %p259_p4 = pnand %p258_p3, %p252_p0 }
  0x12   :  { %225 = vmatpush3.bf16.msra.mxu0 %v245_v5 }
  0x13   :  { %226 = vmatprep.subr.bf16.mxu0 %v275_v1 }
  0x16   :  { %227 = vmatpush3.bf16.msra.mxu0 %v246_v6 }
  0x19   :  { %229 = vmatmul.mubr.msk.bf16.vlgmr.msra.gmra.mrb[0].mxu0 %vm80_vm1, %v24_v8 }
  0xec   :  { %v118_v10 = vpop.f32.mrb[0].mxu0 }
  0xed   :  { %v119_v11 = vadd.f32 %v197_v9, %v118_v10  ;;  %v230_v12 = vpop.f32.mrb[1].mxu0 }
  0xee   :  { %v121_v13 = vpop.f32.mrb[2].mxu0 }
  0xef   :  { %v205_v14 = vmul.f32 -1.442695, %v119_v11  ;;  %v231_v15 = vpop.f32.mrb[3].mxu0 }
  0xf1   :  { %247 = vpow2.f32 %v205_v14 }
  0xfb   :  { %v248_v16 = vpop.eup %247 }
  0xfc   :  { %v127_v17 = vadd.f32 1.0, %v248_v16 }
  0xfe   :  { %249 = vrcp.f32 %v127_v17 }
 0x108   :  { %v250_v18 = vpop.eup %249 }
 0x109   :  { %v131_v19 = vpack.c.bf16 %v250_v18, %v250_v18 }
 0x10b   :  { %v139_v20 = vsel %vm134_vm2, %v131_v19, 0 }
 0x10c   :  { %233 = vmatpush3.bf16.xpose.msra.mxu1 %v139_v20 }
 0x113   :  { %235 = vmatmul.mubr.msk.bf16.vlgmr.msra.gmra.mrb[0].mxu1 %vm134_vm2, %v130_v21 }
 0x1e6   :  { %v175_v23 = vpop.f32.mrb[0].mxu1 }
 0x1e7   :  { %v176_v24 = vadd.f32 %v175_v23, %v133_v22  ;;  %v236_v25 = vpop.f32.mrb[1].mxu1 }
 0x1e8   :  { %v178_v26 = vpop.f32.mrb[2].mxu1 }
 0x1e9   :  { %v237_v27 = vpop.f32.mrb[3].mxu1  ;;  %182 = vst.msk [vmem:[#allocation3] sm:$0x1] %vm181_vm3, %v176_v24 }
 0x1ea   :  { %262 = shalt.err (!%p259_p4)
}
 0x1eb   :  { %s263_s14 = scalar_lea.hbm %s355_s5, 16 }
 0x1ec   :  { %p264_p5 = scmp.ne.s32.totalorder %s355_s5, %s263_s14  ;;  %p267_p6 = scmp.lt.u32.totalorder %s263_s14, %s355_s5 }
 0x1ee   :  { %p269_p7 = pnand %p267_p6, %p264_p5 }
 0x1f0   :  { %272 = shalt.err (!%p269_p7)
}
 0x1f1   :  { %192 = dma.vmem_to_hbm [thread:$0]  %s190_s11, 16, %s355_s5, [#allocation4]  }
 0x1f2   :  { %273 = dma.done.wait [#allocation4], 16  }
 0x1f3   :  { %274 = vsyncadd [#allocation4], 4294967280 }
 0x1f4   :  { %196 = vsyncpa [#allocation4], 1 }

</bundles_post_ra>
